<compile_context>
chip_gen: v5e
topology: v5e:2x2
jax: 0.10.0
libtpu: 0.0.40
codegen_flags: <defaults>
</compile_context>

<pallas_src>
import math

import jax
import jax.numpy as jnp
from jax.experimental import pallas as pl
from jax.experimental.pallas import tpu as pltpu


MAX_TILE_D = 2048               # lane-tile cap (16 vregs wide)
MEGACORE_SPLIT_BYTES = 4 << 20  # only force >=2 grid steps above this size
MAX_FOLDED_DIM = 4096           # cap on wrapper-side lane folding of small dims


def _scale_kernel(ln_mu_ref, ln_sigma_ref, mu_bar_ref, sigma_bar_ref,
                  mu_ref, sigma_ref):
    # ln_*_ref:  (1, tile_d) log-scale parameter tiles (revisited across the
    #            inner batch axis).  exp() rides the otherwise-idle EUP slot.
    # *_bar_ref: (tile_b, tile_d) streamed input tiles
    dt = mu_bar_ref.dtype
    theta_mu = jnp.exp(ln_mu_ref[...].astype(jnp.float32)).astype(dt)
    theta_sigma = jnp.exp(ln_sigma_ref[...].astype(jnp.float32)).astype(dt)
    mu_ref[...] = (theta_mu * mu_bar_ref[...]).astype(mu_ref.dtype)
    sigma_ref[...] = (theta_sigma * sigma_bar_ref[...]).astype(sigma_ref.dtype)


def _sublane_multiple(dtype) -> int:
    # f32 -> 8 rows per vreg tile, bf16 -> 16, int8/fp8 -> 32
    itemsize = jnp.dtype(dtype).itemsize
    return max(8, 32 // itemsize)


def _lane_fold_factor(batch: int, dim: int) -> int:
    """Fold k batch rows into the lane axis so the last dim is a 128-multiple.

    Lane-dense output is the single biggest lever for streaming kernels
    (unmasked vst).  Pure layout plumbing: (batch, dim) -> (batch//k, k*dim)
    is a row-major no-op reshape; theta is tiled k times (tiny).
    """
    if dim % 128 == 0:
        return 1
    k = 128 // math.gcd(dim, 128)       # smallest k with (k * dim) % 128 == 0
    if k <= 1 or batch % k != 0 or k * dim > MAX_FOLDED_DIM:
        return 1
    return k


def _choose_tile_d(dim: int) -> int:
    if dim <= MAX_TILE_D:
        return dim                       # full-extent block: always legal
    if dim % 128 == 0:
        for cand in range(MAX_TILE_D, 127, -128):
            if dim % cand == 0:
                return cand
        return 128
    # Large, non-128-multiple dim: fixed lane-dense tile; the ragged last block
    # is handled by masked stores.  Never tile_d = dim here (VMEM blowup).
    return MAX_TILE_D


def _choose_tile_b(batch: int, tile_d: int, dtype, pipeline_budget: int) -> int:
    itemsize = jnp.dtype(dtype).itemsize
    sub = _sublane_multiple(dtype)
    if batch <= sub:
        return batch                     # full-extent block: always legal
    # 4 streamed arrays (2 in + 2 out), double-buffered by the pipeline.
    bytes_per_row = 4 * 2 * tile_d * itemsize
    cap = max(sub, pipeline_budget // bytes_per_row)
    tile_b = min(batch, cap)
    tile_b -= tile_b % sub
    tile_b = max(tile_b, sub)
    if batch % tile_b:
        # Prefer a divisor (no ragged last block), but only if it stays within
        # 2x of the VMEM-derived tile (don't trade bandwidth for alignment).
        for cand in range(tile_b, sub - 1, -sub):
            if batch % cand == 0:
                if cand >= max(sub, tile_b // 2):
                    tile_b = cand
                break
    return tile_b


def model_forward(ln_theta_mu, ln_theta_sigma, mu_bar, sigma_bar,
                  *, tile_b=None, tile_d=None):
    """ln_theta_*: (dim,), mu_bar/sigma_bar: (batch, dim). Returns (mu, sigma)."""
    batch, dim = mu_bar.shape
    assert sigma_bar.shape == (batch, dim)
    assert ln_theta_mu.shape == (dim,) and ln_theta_sigma.shape == (dim,)
    dtype = mu_bar.dtype

    # VMEM capacity per generation (v5e/v6e: 128 MiB, v7x: 64 MiB).
    try:
        vmem_cap = int(pltpu.get_tpu_info().vmem_capacity_bytes)
    except Exception:
        vmem_cap = 64 * 1024 * 1024      # conservative fallback (v7x physical)

    # Scoped VMEM limit: ~96 MiB on v5e/v6e, ~48 MiB on v7x; the pipeline gets
    # ~70% of it, the rest is headroom (param buffers, compiler scratch).
    vmem_limit = max(32 << 20, min((vmem_cap * 3) // 4, 96 << 20))
    pipeline_budget = (vmem_limit * 7) // 10

    # ---- wrapper-side lane folding for small / unaligned dims (layout only).
    fold = _lane_fold_factor(batch, dim)
    if fold > 1:
        mu_in = mu_bar.reshape(batch // fold, fold * dim)
        sigma_in = sigma_bar.reshape(batch // fold, fold * dim)
        ln_mu_in = jnp.tile(ln_theta_mu, fold)
        ln_sigma_in = jnp.tile(ln_theta_sigma, fold)
        kb, kd = batch // fold, fold * dim
    else:
        mu_in, sigma_in = mu_bar, sigma_bar
        ln_mu_in, ln_sigma_in = ln_theta_mu, ln_theta_sigma
        kb, kd = batch, dim

    ln_mu_in = ln_mu_in.reshape(1, kd)
    ln_sigma_in = ln_sigma_in.reshape(1, kd)

    td = _choose_tile_d(kd) if tile_d is None else tile_d
    tb = _choose_tile_b(kb, td, dtype, pipeline_budget) if tile_b is None else tile_b

    nb = pl.cdiv(kb, tb)
    nd = pl.cdiv(kd, td)

    # Give the v7x megacore >= 2 grid steps, but only when the problem is big
    # enough that a split can pay for the extra pipeline step (tiny inputs on
    # single-TC v5e/v6e stay at one step).
    itemsize = jnp.dtype(dtype).itemsize
    sub = _sublane_multiple(dtype)
    total_bytes = 4 * kb * kd * itemsize
    if nb == 1 and nd == 1 and kb >= 2 * sub and total_bytes >= MEGACORE_SPLIT_BYTES:
        half = ((kb // 2) // sub) * sub
        tb = max(half, sub)
        if kb % tb:
            for cand in range(tb, sub - 1, -sub):
                if kb % cand == 0:
                    tb = cand
                    break
        nb = pl.cdiv(kb, tb)

    # Grid: dim outer, batch inner -> the (1, tile_d) parameter blocks keep the
    # same block index across the inner loop (revisited, not re-DMA'd).
    grid = (nd, nb)
    param_spec = pl.BlockSpec((1, td), lambda j, i: (0, j))
    data_spec = pl.BlockSpec((tb, td), lambda j, i: (i, j))

    mu, sigma = pl.pallas_call(
        _scale_kernel,
        out_shape=(jax.ShapeDtypeStruct((kb, kd), dtype),
                   jax.ShapeDtypeStruct((kb, kd), dtype)),
        grid_spec=pltpu.PrefetchScalarGridSpec(
            num_scalar_prefetch=0,
            grid=grid,
            in_specs=[param_spec, param_spec, data_spec, data_spec],
            out_specs=[data_spec, data_spec],
        ),
        compiler_params=pltpu.CompilerParams(
            dimension_semantics=("parallel", "parallel"),
            vmem_limit_bytes=int(vmem_limit),
        ),
    )(ln_mu_in, ln_sigma_in, mu_in, sigma_in)

    if fold > 1:
        mu = mu.reshape(batch, dim)
        sigma = sigma.reshape(batch, dim)
    return mu, sigma


if __name__ == "__main__":
    key = jax.random.PRNGKey(0)
    k1, k2, k3, k4, k5, k6 = jax.random.split(key, 6)

    # ---- primary test: lane-aligned small shape -------------------------------
    batch, dim = 16, 256
    ln_theta_mu = 0.1 * jax.random.normal(k1, (dim,), dtype=jnp.float32)
    ln_theta_sigma = 0.1 * jax.random.normal(k2, (dim,), dtype=jnp.float32)
    mu_bar = jax.random.normal(k3, (batch, dim), dtype=jnp.float32)
    sigma_bar = jax.random.normal(k4, (batch, dim), dtype=jnp.float32)

    mu, sigma = jax.block_until_ready(
        model_forward(ln_theta_mu, ln_theta_sigma, mu_bar, sigma_bar))

    ref_mu = jnp.exp(ln_theta_mu)[None, :] * mu_bar
    ref_sigma = jnp.exp(ln_theta_sigma)[None, :] * sigma_bar
    assert jnp.allclose(mu, ref_mu, atol=1e-5, rtol=1e-5)
    assert jnp.allclose(sigma, ref_sigma, atol=1e-5, rtol=1e-5)

    # Literal PyTorch init (zeros -> theta == 1 -> identity, exact).
    zeros = jnp.zeros((dim,), jnp.float32)
    mu0, sigma0 = jax.block_until_ready(
        model_forward(zeros, zeros, mu_bar, sigma_bar))
    assert jnp.allclose(mu0, mu_bar, atol=1e-6, rtol=1e-6)
    assert jnp.allclose(sigma0, sigma_bar, atol=1e-6, rtol=1e-6)

    # ---- secondary test: small unaligned dim exercises the lane-fold path -----
    batch2, dim2 = 16, 64
    ln_mu2 = 0.1 * jax.random.normal(k5, (dim2,), dtype=jnp.float32)
    ln_sg2 = 0.1 * jax.random.normal(k6, (dim2,), dtype=jnp.float32)
    mu_bar2 = jax.random.normal(k3, (batch2, dim2), dtype=jnp.float32)
    sigma_bar2 = jax.random.normal(k4, (batch2, dim2), dtype=jnp.float32)

    mu2, sigma2 = jax.block_until_ready(
        model_forward(ln_mu2, ln_sg2, mu_bar2, sigma_bar2))
    assert jnp.allclose(mu2, jnp.exp(ln_mu2)[None, :] * mu_bar2,
                        atol=1e-5, rtol=1e-5)
    assert jnp.allclose(sigma2, jnp.exp(ln_sg2)[None, :] * sigma_bar2,
                        atol=1e-5, rtol=1e-5)

    print("KERNEL_OK")
</pallas_src>

<mosaic_0001>
module attributes {stable_mosaic.version = 11 : i64} {
  func.func @_scale_kernel(%arg0: i32, %arg1: i32, %arg2: memref<1x256xf32, #tpu.memory_space<vmem>>, %arg3: memref<1x256xf32, #tpu.memory_space<vmem>>, %arg4: memref<16x256xf32, #tpu.memory_space<vmem>>, %arg5: memref<16x256xf32, #tpu.memory_space<vmem>>, %arg6: memref<16x256xf32, #tpu.memory_space<vmem>>, %arg7: memref<16x256xf32, #tpu.memory_space<vmem>>) attributes {dimension_semantics = [#tpu.dimension_semantics<parallel>, #tpu.dimension_semantics<parallel>], iteration_bounds = array<i64: 1, 1>, scalar_prefetch = 0 : i64, scratch_operands = 0 : i64, tpu.core_type = #tpu.core_type<tc>, window_params = [{transform_indices = @transform_0, window_bounds = array<i64: 1, 256>}, {transform_indices = @transform_1, window_bounds = array<i64: 1, 256>}, {transform_indices = @transform_2, window_bounds = array<i64: 16, 256>}, {transform_indices = @transform_3, window_bounds = array<i64: 16, 256>}, {transform_indices = @transform_4, window_bounds = array<i64: 16, 256>}, {transform_indices = @transform_5, window_bounds = array<i64: 16, 256>}]} {
    %c0 = arith.constant 0 : index
    %c0_0 = arith.constant 0 : index
    %0 = vector.load %arg2[%c0, %c0_0] : memref<1x256xf32, #tpu.memory_space<vmem>>, vector<1x256xf32>
    %1 = math.exp %0 : vector<1x256xf32>
    %c0_1 = arith.constant 0 : index
    %c0_2 = arith.constant 0 : index
    %2 = vector.load %arg3[%c0_1, %c0_2] : memref<1x256xf32, #tpu.memory_space<vmem>>, vector<1x256xf32>
    %3 = math.exp %2 : vector<1x256xf32>
    %c0_3 = arith.constant 0 : index
    %c0_4 = arith.constant 0 : index
    %4 = vector.load %arg4[%c0_3, %c0_4] : memref<16x256xf32, #tpu.memory_space<vmem>>, vector<16x256xf32>
    %5 = vector.broadcast %1 : vector<1x256xf32> to vector<16x256xf32>
    %6 = arith.mulf %5, %4 : vector<16x256xf32>
    %c0_5 = arith.constant 0 : index
    %c0_6 = arith.constant 0 : index
    %7 = vector.load %arg6[%c0_5, %c0_6] : memref<16x256xf32, #tpu.memory_space<vmem>>, vector<16x256xf32>
    tpu.vector_store %arg6[%c0_5, %c0_6], %6 {strides = array<i32>} : memref<16x256xf32, #tpu.memory_space<vmem>>, vector<16x256xf32>,
    %c0_7 = arith.constant 0 : index
    %c0_8 = arith.constant 0 : index
    %8 = vector.load %arg5[%c0_7, %c0_8] : memref<16x256xf32, #tpu.memory_space<vmem>>, vector<16x256xf32>
    %9 = vector.broadcast %3 : vector<1x256xf32> to vector<16x256xf32>
    %10 = arith.mulf %9, %8 : vector<16x256xf32>
    %c0_9 = arith.constant 0 : index
    %c0_10 = arith.constant 0 : index
    %11 = vector.load %arg7[%c0_9, %c0_10] : memref<16x256xf32, #tpu.memory_space<vmem>>, vector<16x256xf32>
    tpu.vector_store %arg7[%c0_9, %c0_10], %10 {strides = array<i32>} : memref<16x256xf32, #tpu.memory_space<vmem>>, vector<16x256xf32>,
    return
  }
  func.func @transform_0(%arg0: i32, %arg1: i32) -> (i32, i32) {
    %c0_i32 = arith.constant 0 : i32
    %c0_i32_0 = arith.constant 0 : i32
    return %c0_i32, %arg0 : i32, i32
  }
  func.func @transform_1(%arg0: i32, %arg1: i32) -> (i32, i32) {
    %c0_i32 = arith.constant 0 : i32
    %c0_i32_0 = arith.constant 0 : i32
    return %c0_i32, %arg0 : i32, i32
  }
  func.func @transform_2(%arg0: i32, %arg1: i32) -> (i32, i32) {
    %c0_i32 = arith.constant 0 : i32
    return %arg1, %arg0 : i32, i32
  }
  func.func @transform_3(%arg0: i32, %arg1: i32) -> (i32, i32) {
    %c0_i32 = arith.constant 0 : i32
    return %arg1, %arg0 : i32, i32
  }
  func.func @transform_4(%arg0: i32, %arg1: i32) -> (i32, i32) {
    %c0_i32 = arith.constant 0 : i32
    return %arg1, %arg0 : i32, i32
  }
  func.func @transform_5(%arg0: i32, %arg1: i32) -> (i32, i32) {
    %c0_i32 = arith.constant 0 : i32
    return %arg1, %arg0 : i32, i32
  }
}

</mosaic_0001>

<bundles_post_ra>
// kernel: tpu_custom_call.1
= control target key start
LH: loop header
LB: loop body
LE: loop exit
PB: predicated region body
PF: predicated region fallthrough
CT: control target
= control target key end

     0   :  { %11 = vsyncpa [#allocation3], 0  ;;  %s393_s0 = inlined_call_operand.hbm [shape: f32[1,256], index: 0, kind: input, shape index: {}]   ;;  %s394_s1 = inlined_call_operand.hbm [shape: f32[1,256], index: 1, kind: input, shape index: {}]   ;;  %s395_s2 = inlined_call_operand.hbm [shape: f32[16,256], index: 2, kind: input, shape index: {}]   ;;  %s396_s3 = inlined_call_operand.hbm [shape: f32[16,256], index: 3, kind: input, shape index: {}]   ;;  %s397_s4 = inlined_call_operand.hbm [shape: f32[16,256], index: 4, kind: output, shape index: {0}]   ;;  %s398_s5 = inlined_call_operand.hbm [shape: f32[16,256], index: 5, kind: output, shape index: {1}]  }
   0x1   :  { %12 = vsyncpa [#allocation6], 0 }
   0x2   :  { %13 = vsyncpa [#allocation9], 0 }
   0x3   :  { %14 = vsyncpa [#allocation4], 0  ;;  %s32_s20 = sshll.u32 %s394_s1, 4  ;;  %s33_s20 = int_to_ptr.hbm [resolvable:$true] %s32_s20 }
   0x4   :  { %15 = vsyncpa [#allocation12], 0  ;;  %s325_s21 = smov [#allocation5]   ;;  %s21_s25 = sshll.u32 %s393_s0, 4  ;;  %s22_s25 = int_to_ptr.hbm [resolvable:$true] %s21_s25 }
   0x5   :  { %s34_s22 = sshll.u32 %s325_s21, 4  ;;  %s326_s26 = smov [#allocation2]   ;;  %s35_s22 = int_to_ptr.vmem [resolvable:$true] %s34_s22 }
   0x6   :  { %37 = dma.hbm_to_vmem [thread:$0]  %s33_s20, 32, %s35_s22, [#allocation6]  }
   0x7   :  { %s23_s27 = sshll.u32 %s326_s26, 4  ;;  %s42_s30 = sshll.u32 %s395_s2, 4  ;;  %s24_s27 = int_to_ptr.vmem [resolvable:$true] %s23_s27  ;;  %s43_s30 = int_to_ptr.hbm [resolvable:$true] %s42_s30 }
   0x8   :  { %26 = dma.hbm_to_vmem [thread:$0]  %s22_s25, 32, %s24_s27, [#allocation3]  }
   0x9   :  { %s327_s1 = smov [#allocation7]   ;;  %s55_s9 = sshll.u32 %s396_s3, 4  ;;  %s56_s9 = int_to_ptr.hbm [resolvable:$true] %s55_s9 }
   0xa   :  { %s44_s6 = sshll.u32 %s327_s1, 4  ;;  %s328_s10 = smov 256   ;;  %s45_s6 = int_to_ptr.vmem [resolvable:$true] %s44_s6 }
   0xb   :  { %s329_s0 = smov 16   ;;  %s330_s11 = smov [#allocation8]  }
   0xc   :  { %50 = dma.hbm_to_vmem [thread:$0]  %s43_s30, 512, %s45_s6, [#allocation6], %s328_s10, %s328_s10, %s329_s0  }
   0xd   :  { %s57_s12 = sshll.u32 %s330_s11, 4  ;;  %s58_s12 = int_to_ptr.vmem [resolvable:$true] %s57_s12 }
   0xe   :  { %63 = dma.hbm_to_vmem [thread:$0]  %s56_s9, 512, %s58_s12, [#allocation9], %s328_s10, %s328_s10, %s329_s0  }
   0xf   :  { %315 = dma.done.wait [#allocation3], 32  }
  0x10   :  { %316 = vsyncadd [#allocation3], 4294967264 }
  0x11   :  { %317 = dma.done.wait [#allocation6], 544  }
  0x12   :  { %318 = vsyncadd [#allocation6], 4294966752 }
  0x13   :  { %319 = dma.done.wait [#allocation9], 512  }
  0x14   :  { %320 = vsyncadd [#allocation9], 4294966784  ;;  %v80_v0 = vld [vmem:[#allocation2] sm:$0x3]  ;;  %v83_v2 = vld [vmem:[#allocation5] sm:$0x3] }
  0x15   :  { %v81_v1 = vmul.f32 1.442695, %v80_v0  ;;  %v84_v3 = vmul.f32 1.442695, %v83_v2  ;;  %v86_v5 = vld [vmem:[#allocation7] sm:$0xff]  ;;  %v87_v6 = vld [vmem:[#allocation7 + $0x8] sm:$0xff] }
  0x16   :  { %v88_v7 = vld [vmem:[#allocation7 + $0x10] sm:$0xff]  ;;  %v89_v11 = vld [vmem:[#allocation7 + $0x18] sm:$0xff]  ;;  %v103_v12 = vld [vmem:[#allocation8] sm:$0xff]  ;;  %s331_s2 = smov [#allocation10]   ;;  %s126_s15 = sshll.u32 %s397_s4, 4  ;;  %s127_s15 = int_to_ptr.hbm [resolvable:$true] %s126_s15 }
  0x17   :  { %167 = vpow2.f32 %v81_v1  ;;  %v104_v18 = vld [vmem:[#allocation8 + $0x8] sm:$0xff]  ;;  %s124_s3 = sshll.u32 %s331_s2, 4  ;;  %v105_v20 = vld [vmem:[#allocation8 + $0x10] sm:$0xff]  ;;  %v106_v22 = vld [vmem:[#allocation8 + $0x18] sm:$0xff]  ;;  %s332_s16 = smov [#allocation11]   ;;  %s125_s3 = int_to_ptr.vmem [resolvable:$true] %s124_s3 }
  0x18   :  { %169 = vpow2.f32 %v84_v3  ;;  %s137_s17 = sshll.u32 %s332_s16, 4  ;;  %s139_s20 = sshll.u32 %s398_s5, 4  ;;  %s138_s17 = int_to_ptr.vmem [resolvable:$true] %s137_s17  ;;  %s140_s20 = int_to_ptr.hbm [resolvable:$true] %s139_s20 }
  0x1d   :  { %v168_v4 = vpop.eup %167 }
  0x1e   :  { %v170_v8 = vpop.eup %169  ;;  %v91_v9 = vperm.slane %v168_v4, 0  ;;  %v92_v10 = vperm.slane %v168_v4, 1 }
  0x1f   :  { %v108_v13 = vperm.slane %v170_v8, 0  ;;  %v109_v14 = vperm.slane %v170_v8, 1 }
  0x20   :  { %v95_v15 = vmul.f32 %v91_v9, %v86_v5  ;;  %v96_v16 = vmul.f32 %v92_v10, %v87_v6  ;;  %v97_v17 = vmul.f32 %v91_v9, %v88_v7  ;;  %v98_v19 = vmul.f32 %v92_v10, %v89_v11 }
  0x21   :  { %v112_v21 = vmul.f32 %v108_v13, %v103_v12  ;;  %v113_v23 = vmul.f32 %v109_v14, %v104_v18  ;;  %v114_v24 = vmul.f32 %v108_v13, %v105_v20  ;;  %v115_v25 = vmul.f32 %v109_v14, %v106_v22 }
  0x22   :  { %99 = vst [vmem:[#allocation10] sm:$0xff] %v95_v15 }
  0x23   :  { %100 = vst [vmem:[#allocation10 + $0x8] sm:$0xff] %v96_v16 }
  0x24   :  { %101 = vst [vmem:[#allocation10 + $0x10] sm:$0xff] %v97_v17 }
  0x25   :  { %102 = vst [vmem:[#allocation10 + $0x18] sm:$0xff] %v98_v19 }
  0x26   :  { %116 = vst [vmem:[#allocation11] sm:$0xff] %v112_v21  ;;  %132 = dma.vmem_to_hbm [thread:$0]  %s125_s3, 512, %s127_s15, [#allocation4], %s328_s10, %s328_s10, %s329_s0  }
  0x27   :  { %117 = vst [vmem:[#allocation11 + $0x8] sm:$0xff] %v113_v23 }
  0x28   :  { %118 = vst [vmem:[#allocation11 + $0x10] sm:$0xff] %v114_v24 }
  0x29   :  { %119 = vst [vmem:[#allocation11 + $0x18] sm:$0xff] %v115_v25 }
  0x2a   :  { %145 = dma.vmem_to_hbm [thread:$0]  %s138_s17, 512, %s140_s20, [#allocation12], %s328_s10, %s328_s10, %s329_s0  }
  0x2b   :  { %321 = dma.done.wait [#allocation4], 512  }
  0x2c   :  { %322 = vsyncadd [#allocation4], 4294966784 }
  0x2d   :  { %323 = dma.done.wait [#allocation12], 512  }
  0x2e   :  { %324 = vsyncadd [#allocation12], 4294966784 }
  0x2f   :  { %154 = vsyncpa [#allocation3], 1 }
  0x30   :  { %155 = vsyncpa [#allocation6], 1 }
  0x31   :  { %156 = vsyncpa [#allocation9], 1 }
  0x32   :  { %157 = vsyncpa [#allocation4], 1 }
  0x33   :  { %158 = vsyncpa [#allocation12], 1 }

</bundles_post_ra>
